<compile_context>
chip_gen: v7x
topology: tpu7x:2x2x1
jax: 0.10.0
libtpu: 0.0.40
codegen_flags: <defaults>
</compile_context>

<pallas_src>
import jax
import jax.numpy as jnp
from jax.experimental import pallas as pl
from jax.experimental.pallas import tpu as pltpu


def _round_up(n, m):
    return ((n + m - 1) // m) * m


def _num_tensorcores_per_chip():
    """Best-effort: 2 on v7x (2 TCs/chip), 1 on v5e/v6e. Safe fallback = 1."""
    try:
        kind = jax.devices()[0].device_kind.lower()
    except Exception:
        return 1
    return 2 if "v7" in kind else 1


# ---------------------------------------------------------------------------
# Kernel body: fused fc1 -> ReLU -> fc2 on one batch tile.
# ---------------------------------------------------------------------------
def _mlp_kernel(x_ref, w1_ref, b1_ref, w2_ref, b2_ref, o_ref):
    # Cast raw f32 activations to the weight dtype (bf16) on the VPU.
    x = x_ref[...].astype(w1_ref.dtype)
    # fc1: (tb, in) @ (in, hid_p) -> f32 accumulator on the MXU.
    h = jnp.dot(x, w1_ref[...], preferred_element_type=jnp.float32)
    # Bias + ReLU kept in f32 (v5e has no bf16 VPU path).
    h = jnp.maximum(h + b1_ref[...], 0.0)
    # fc2: (tb, hid_p) @ (hid_p, out) -> f32 accumulator.
    y = jnp.dot(h.astype(w2_ref.dtype), w2_ref[...],
                preferred_element_type=jnp.float32)
    o_ref[...] = (y + b2_ref[...]).astype(o_ref.dtype)


# ---------------------------------------------------------------------------
# One-time parameter preparation (hoisted out of the per-step forward).
# ---------------------------------------------------------------------------
def prepare_params(w1, b1, w2, b2):
    """Pad/cast nn.Linear-style params once.

    w1: (hidden_dim, input_dim), b1: (hidden_dim,)
    w2: (output_dim, hidden_dim), b2: (output_dim,)
    Returns (w1_t, b1_p, w2_t, b2_p) ready for emotion_classifier_forward.
    Zero padding of the hidden dim is exact: padded hidden cols see zero
    weights + zero bias -> relu(0)=0, and the matching W2^T rows are zero.
    """
    hidden_dim, input_dim = w1.shape
    output_dim = w2.shape[0]
    hid_p = _round_up(hidden_dim, 128)

    w1_t = jnp.pad(w1.T.astype(jnp.bfloat16),
                   ((0, 0), (0, hid_p - hidden_dim)))            # (in, hid_p)
    b1_p = jnp.pad(b1.astype(jnp.float32),
                   (0, hid_p - hidden_dim)).reshape(1, hid_p)    # (1, hid_p)
    w2_t = jnp.pad(w2.T.astype(jnp.bfloat16),
                   ((0, hid_p - hidden_dim), (0, 0)))            # (hid_p, out)
    b2_p = b2.astype(jnp.float32).reshape(1, output_dim)         # (1, out)
    return w1_t, b1_p, w2_t, b2_p


# ---------------------------------------------------------------------------
# Forward wrapper.
# ---------------------------------------------------------------------------
def emotion_classifier_forward(x, w1_t, b1_p, w2_t, b2_p, *, block_batch=None):
    """y = relu(x @ W1.T + b1) @ W2.T + b2.

    x    : (B, input_dim) f32 (raw, unpadded)
    w1_t : (input_dim, hid_p)  bf16   (from prepare_params)
    b1_p : (1, hid_p)          f32
    w2_t : (hid_p, output_dim) bf16
    b2_p : (1, output_dim)     f32
    returns (B, output_dim) in x.dtype
    """
    B, input_dim = x.shape
    hid_p = w1_t.shape[1]
    output_dim = w2_t.shape[1]
    out_dtype = x.dtype

    # ---- batch tile: fewest/largest tiles up to 512 rows, minimal padding.
    if block_batch is not None:
        tb = max(8, _round_up(block_batch, 8))
    elif B <= 512:
        tb = _round_up(B, 8)
    else:
        # Pick the candidate tile that wastes the least batch padding.
        candidates = (512, 384, 256)
        tb = min(candidates, key=lambda t: (_round_up(B, t) - B, -t))

    # v7x only: make sure both TensorCores get work for large batches.
    if block_batch is None and _num_tensorcores_per_chip() >= 2 and B >= 256:
        tb = min(tb, _round_up(pl.cdiv(B, 2), 8))

    B_p = _round_up(B, tb)
    grid = (B_p // tb,)

    # Pad the batch only when needed (rows are independent; padded rows are
    # computed but sliced off afterwards and never read).
    x_in = x if B_p == B else jnp.pad(x, ((0, B_p - B), (0, 0)))

    # ---- VMEM budget (tiny here; cap at 32 MiB, never the full v7x 64 MiB).
    tile_bytes = tb * input_dim * 4 + tb * output_dim * 4
    weight_bytes = (input_dim * hid_p + hid_p * output_dim) * 2 \
        + (hid_p + output_dim) * 4
    hidden_bytes = tb * hid_p * 4
    vmem_needed = 2 * tile_bytes + weight_bytes + hidden_bytes
    vmem_limit = int(min(max(4 * vmem_needed, 16 << 20), 32 << 20))

    cost = pl.CostEstimate(
        flops=2 * B_p * (input_dim * hid_p + hid_p * output_dim),
        transcendentals=0,
        bytes_accessed=(B_p * input_dim * 4 + B_p * output_dim * 4
                        + weight_bytes),
    )

    out = pl.pallas_call(
        _mlp_kernel,
        out_shape=jax.ShapeDtypeStruct((B_p, output_dim), out_dtype),
        grid_spec=pltpu.PrefetchScalarGridSpec(
            num_scalar_prefetch=0,
            grid=grid,
            in_specs=[
                # Raw x tile; last block dim == full array dim (legal, unpadded).
                pl.BlockSpec((tb, input_dim), lambda i: (i, 0)),
                pl.BlockSpec((input_dim, hid_p), lambda i: (0, 0)),   # W1^T
                pl.BlockSpec((1, hid_p), lambda i: (0, 0)),           # b1
                pl.BlockSpec((hid_p, output_dim), lambda i: (0, 0)),  # W2^T
                pl.BlockSpec((1, output_dim), lambda i: (0, 0)),      # b2
            ],
            # Unpadded output: last block dim == full array dim.
            out_specs=pl.BlockSpec((tb, output_dim), lambda i: (i, 0)),
        ),
        compiler_params=pltpu.CompilerParams(
            dimension_semantics=("parallel",),
            vmem_limit_bytes=vmem_limit,
        ),
        cost_estimate=cost,
    )(x_in, w1_t, b1_p, w2_t, b2_p)

    return out if B_p == B else out[:B]


# ---------------------------------------------------------------------------
# Test harness.
# ---------------------------------------------------------------------------
def init_params(key, input_dim, hidden_dim, output_dim, dtype=jnp.float32):
    """Deterministic synthetic parameters with nn.Linear-like shapes."""
    k1, k2, k3, k4 = jax.random.split(key, 4)
    w1 = jax.random.normal(k1, (hidden_dim, input_dim), dtype) * 0.1
    b1 = jax.random.normal(k2, (hidden_dim,), dtype) * 0.1
    w2 = jax.random.normal(k3, (output_dim, hidden_dim), dtype) * 0.1
    b2 = jax.random.normal(k4, (output_dim,), dtype) * 0.1
    return w1, b1, w2, b2


def _reference(x, w1, b1, w2, b2):
    return jnp.maximum(x @ w1.T + b1, 0.0) @ w2.T + b2


if __name__ == "__main__":
    batch, input_dim, hidden_dim, output_dim = 8, 32, 64, 8

    key = jax.random.PRNGKey(0)
    kx, kp = jax.random.split(key)
    x = jax.random.normal(kx, (batch, input_dim), jnp.float32)
    w1, b1, w2, b2 = init_params(kp, input_dim, hidden_dim, output_dim)

    # One-time parameter prep (padding + bf16 cast hoisted out of forward).
    w1_t, b1_p, w2_t, b2_p = prepare_params(w1, b1, w2, b2)

    out = emotion_classifier_forward(x, w1_t, b1_p, w2_t, b2_p)
    out = jax.block_until_ready(out)

    ref = _reference(x, w1, b1, w2, b2)
    assert out.shape == (batch, output_dim)
    # bf16 MXU operands with f32 accumulation -> loosened tolerance.
    assert jnp.allclose(out, ref, atol=5e-2, rtol=5e-2), "mismatch vs reference"

    # Second check: multi-step grid (tiled batch) to exercise the pipeline path.
    batch2 = 256
    x2 = jax.random.normal(jax.random.PRNGKey(1), (batch2, input_dim), jnp.float32)
    out2 = jax.block_until_ready(
        emotion_classifier_forward(x2, w1_t, b1_p, w2_t, b2_p, block_batch=128))
    ref2 = _reference(x2, w1, b1, w2, b2)
    assert out2.shape == (batch2, output_dim)
    assert jnp.allclose(out2, ref2, atol=5e-2, rtol=5e-2), "mismatch (tiled)"

    # Third check: batch not a multiple of the tile (partial-pad path).
    batch3 = 20
    x3 = jax.random.normal(jax.random.PRNGKey(2), (batch3, input_dim), jnp.float32)
    out3 = jax.block_until_ready(
        emotion_classifier_forward(x3, w1_t, b1_p, w2_t, b2_p, block_batch=16))
    ref3 = _reference(x3, w1, b1, w2, b2)
    assert out3.shape == (batch3, output_dim)
    assert jnp.allclose(out3, ref3, atol=5e-2, rtol=5e-2), "mismatch (ragged)"

    print("KERNEL_OK")
</pallas_src>

<mosaic_0001>
module attributes {stable_mosaic.version = 11 : i64} {
  func.func @_mlp_kernel(%arg0: i32, %arg1: memref<8x32xf32, #tpu.memory_space<vmem>>, %arg2: memref<32x128xbf16, #tpu.memory_space<vmem>>, %arg3: memref<1x128xf32, #tpu.memory_space<vmem>>, %arg4: memref<128x8xbf16, #tpu.memory_space<vmem>>, %arg5: memref<1x8xf32, #tpu.memory_space<vmem>>, %arg6: memref<8x8xf32, #tpu.memory_space<vmem>>) attributes {dimension_semantics = [#tpu.dimension_semantics<parallel>], iteration_bounds = array<i64: 1>, scalar_prefetch = 0 : i64, scratch_operands = 0 : i64, tpu.core_type = #tpu.core_type<tc>, window_params = [{transform_indices = @transform_0, window_bounds = array<i64: 8, 32>}, {pipeline_mode = #tpu.pipeline_mode<synchronous>, transform_indices = @transform_1, window_bounds = array<i64: 32, 128>}, {pipeline_mode = #tpu.pipeline_mode<synchronous>, transform_indices = @transform_2, window_bounds = array<i64: 1, 128>}, {pipeline_mode = #tpu.pipeline_mode<synchronous>, transform_indices = @transform_3, window_bounds = array<i64: 128, 8>}, {pipeline_mode = #tpu.pipeline_mode<synchronous>, transform_indices = @transform_4, window_bounds = array<i64: 1, 8>}, {transform_indices = @transform_5, window_bounds = array<i64: 8, 8>}]} {
    %c0 = arith.constant 0 : index
    %c0_0 = arith.constant 0 : index
    %0 = vector.load %arg1[%c0, %c0_0] : memref<8x32xf32, #tpu.memory_space<vmem>>, vector<8x32xf32>
    %1 = arith.truncf %0 : vector<8x32xf32> to vector<8x32xbf16>
    %c0_1 = arith.constant 0 : index
    %c0_2 = arith.constant 0 : index
    %2 = vector.load %arg2[%c0_1, %c0_2] : memref<32x128xbf16, #tpu.memory_space<vmem>>, vector<32x128xbf16>
    %cst = arith.constant dense<0.000000e+00> : vector<8x128xf32>
    %3 = tpu.matmul %1, %2, %cst {dimension_numbers = #tpu.dot_dimension_numbers<[1], [0], [0], [1], [0, 0, 1, 1], [], []>} : vector<8x32xbf16>, vector<32x128xbf16>, vector<8x128xf32> -> vector<8x128xf32>
    %c0_3 = arith.constant 0 : index
    %c0_4 = arith.constant 0 : index
    %4 = vector.load %arg3[%c0_3, %c0_4] : memref<1x128xf32, #tpu.memory_space<vmem>>, vector<1x128xf32>
    %5 = vector.broadcast %4 : vector<1x128xf32> to vector<8x128xf32>
    %6 = arith.addf %3, %5 : vector<8x128xf32>
    %cst_5 = arith.constant 0.000000e+00 : f32
    %7 = vector.broadcast %cst_5 : f32 to vector<8x128xf32>
    %8 = arith.maximumf %6, %7 : vector<8x128xf32>
    %9 = arith.truncf %8 : vector<8x128xf32> to vector<8x128xbf16>
    %c0_6 = arith.constant 0 : index
    %c0_7 = arith.constant 0 : index
    %10 = vector.load %arg4[%c0_6, %c0_7] : memref<128x8xbf16, #tpu.memory_space<vmem>>, vector<128x8xbf16>
    %cst_8 = arith.constant dense<0.000000e+00> : vector<8x8xf32>
    %11 = tpu.matmul %9, %10, %cst_8 {dimension_numbers = #tpu.dot_dimension_numbers<[1], [0], [0], [1], [0, 0, 1, 1], [], []>} : vector<8x128xbf16>, vector<128x8xbf16>, vector<8x8xf32> -> vector<8x8xf32>
    %c0_9 = arith.constant 0 : index
    %c0_10 = arith.constant 0 : index
    %12 = vector.load %arg5[%c0_9, %c0_10] : memref<1x8xf32, #tpu.memory_space<vmem>>, vector<1x8xf32>
    %13 = vector.broadcast %12 : vector<1x8xf32> to vector<8x8xf32>
    %14 = arith.addf %11, %13 : vector<8x8xf32>
    %c0_11 = arith.constant 0 : index
    %c0_12 = arith.constant 0 : index
    %15 = vector.load %arg6[%c0_11, %c0_12] : memref<8x8xf32, #tpu.memory_space<vmem>>, vector<8x8xf32>
    tpu.vector_store %arg6[%c0_11, %c0_12], %14 {strides = array<i32>} : memref<8x8xf32, #tpu.memory_space<vmem>>, vector<8x8xf32>,
    return
  }
  func.func @transform_0(%arg0: i32) -> (i32, i32) {
    %c0_i32 = arith.constant 0 : i32
    %c0_i32_0 = arith.constant 0 : i32
    return %arg0, %c0_i32 : i32, i32
  }
  func.func @transform_1(%arg0: i32) -> (i32, i32) {
    %c0_i32 = arith.constant 0 : i32
    %c0_i32_0 = arith.constant 0 : i32
    %c0_i32_1 = arith.constant 0 : i32
    return %c0_i32, %c0_i32_0 : i32, i32
  }
  func.func @transform_2(%arg0: i32) -> (i32, i32) {
    %c0_i32 = arith.constant 0 : i32
    %c0_i32_0 = arith.constant 0 : i32
    %c0_i32_1 = arith.constant 0 : i32
    return %c0_i32, %c0_i32_0 : i32, i32
  }
  func.func @transform_3(%arg0: i32) -> (i32, i32) {
    %c0_i32 = arith.constant 0 : i32
    %c0_i32_0 = arith.constant 0 : i32
    %c0_i32_1 = arith.constant 0 : i32
    return %c0_i32, %c0_i32_0 : i32, i32
  }
  func.func @transform_4(%arg0: i32) -> (i32, i32) {
    %c0_i32 = arith.constant 0 : i32
    %c0_i32_0 = arith.constant 0 : i32
    %c0_i32_1 = arith.constant 0 : i32
    return %c0_i32, %c0_i32_0 : i32, i32
  }
  func.func @transform_5(%arg0: i32) -> (i32, i32) {
    %c0_i32 = arith.constant 0 : i32
    %c0_i32_0 = arith.constant 0 : i32
    return %arg0, %c0_i32 : i32, i32
  }
}

</mosaic_0001>

<bundles_post_ra>
// kernel: tpu_custom_call.1
= control target key start
LH: loop header
LB: loop body
LE: loop exit
PB: predicated region body
PF: predicated region fallthrough
CT: control target
= control target key end

     0   :  { %v310_v1 = vmov 0.0   ;;  %vm311_vm0 = vmmov 0   ;;  %vm47_vm1 = vcmask 261120   ;;  %s394_s0 = inlined_call_operand.vmem [shape: f32[8,32], index: 0, kind: input, shape index: {}]   ;;  %s395_s1 = inlined_call_operand.vmem [shape: bf16[32,128], index: 1, kind: input, shape index: {}]   ;;  %s396_s2 = inlined_call_operand.vmem [shape: f32[1,128], index: 2, kind: input, shape index: {}]   ;;  %s397_s3 = inlined_call_operand.vmem [shape: bf16[128,8], index: 3, kind: input, shape index: {}]   ;;  %s398_s4 = inlined_call_operand.vmem [shape: f32[1,8], index: 4, kind: input, shape index: {}]   ;;  %s399_s5 = inlined_call_operand.hbm [shape: f32[8,8], index: 5, kind: output, shape index: {}]  }
   0x1   :  { %v276_v0 = vld [vmem:[%s395_s1] sm:$0xff]   ;;  %245 = vmatprep.subr.bf16.mxu0 %v310_v1  ;;  %v277_v2 = vld [vmem:[%s395_s1 + $0x8] sm:$0xff]   ;;  %253 = vmatprep.subr.bf16.mxu1 %v310_v1  ;;  %v280_v7 = vld [vmem:[%s397_s3 + $0x10] sm:$0xff]  }
   0x2   :  { %246 = vmatpush3.bf16.msra.mxu0 %v276_v0  ;;  %249 = vmatprep.mubr.msk.bf16.mxu0 %vm311_vm0, %v310_v1  ;;  %v22_v3 = vld [vmem:[%s394_s0] sm:$0xff]  ;;  %v279_v6 = vld [vmem:[%s397_s3 + $0x8] sm:$0xff]  }
   0x3   :  { %247 = vmatprep.subr.bf16.mxu0 %v310_v1  ;;  %v278_v4 = vld [vmem:[%s397_s3] sm:$0xff]   ;;  %269 = vmatprep.mubr.msk.bf16.mxu1 %vm311_vm0, %v310_v1  ;;  %v23_v5 = vpack.c.bf16 %v22_v3, %v22_v3 }
   0x4   :  { %254 = vmatpush3.bf16.msra.mxu1 %v278_v4 }
   0x5   :  { %255 = vmatprep.subr.bf16.mxu1 %v310_v1 }
   0x6   :  { %248 = vmatpush3.bf16.msra.mxu0 %v277_v2 }
   0x8   :  { %256 = vmatpush3.bf16.msra.mxu1 %v279_v6 }
   0x9   :  { %250 = vmatmul.mubr.msk.bf16.vlgmr.msra.gmra.mrb[0].mxu0 %vm47_vm1, %v23_v5  ;;  %257 = vmatprep.subr.bf16.mxu1 %v310_v1 }
   0xa   :  { %10 = vsyncpa [#allocation3], 0  ;;  %v281_v8 = vld [vmem:[%s397_s3 + $0x18] sm:$0xff]   ;;  %v282_v9 = vld [vmem:[%s397_s3 + $0x20] sm:$0xff]   ;;  %s312_s17 = smov [#allocation2]   ;;  %vm204_vm2 = vcmask 64512  }
   0xb   :  { %v283_v10 = vld [vmem:[%s397_s3 + $0x28] sm:$0xff]   ;;  %v284_v11 = vld [vmem:[%s397_s3 + $0x30] sm:$0xff]   ;;  %v285_v12 = vld [vmem:[%s397_s3 + $0x38] sm:$0xff]   ;;  %s212_s18 = sshll.u32 %s312_s17, 4  ;;  %s213_s18 = int_to_ptr.vmem [resolvable:$true] %s212_s18 }
   0xc   :  { %258 = vmatpush3.bf16.msra.mxu1 %v280_v7  ;;  %v220_v13 = vld [vmem:[%s396_s2] ss:$0 sm:$0xff]  ;;  %s286_s2 = scalar_lea.vmem %s213_s18, 128  ;;  %p291_p1 = scmp.lt.s32.totalorder %s213_s18, %s213_s18 }
   0xd   :  { %259 = vmatprep.subr.bf16.mxu1 %v310_v1  ;;  %v224_v21 = vld [vmem:[%s398_s4] ss:$0 sm:$0xff]  ;;  %p287_p0 = scmp.ne.s32.totalorder %s213_s18, %s286_s2  ;;  %p292_p2 = scmp.lt.s32.totalorder %s286_s2, %s286_s2 }
   0xf   :  { %p293_p3 = por %p292_p2, %p291_p1 }
  0x10   :  { %260 = vmatpush3.bf16.msra.mxu1 %v281_v8 }
  0x11   :  { %261 = vmatprep.subr.bf16.mxu1 %v310_v1  ;;  %p294_p4 = pnand %p293_p3, %p287_p0 }
  0x14   :  { %262 = vmatpush3.bf16.msra.mxu1 %v282_v9 }
  0x15   :  { %263 = vmatprep.subr.bf16.mxu1 %v310_v1 }
  0x18   :  { %264 = vmatpush3.bf16.msra.mxu1 %v283_v10 }
  0x19   :  { %265 = vmatprep.subr.bf16.mxu1 %v310_v1 }
  0x1c   :  { %266 = vmatpush3.bf16.msra.mxu1 %v284_v11 }
  0x1d   :  { %267 = vmatprep.subr.bf16.mxu1 %v310_v1 }
  0x20   :  { %268 = vmatpush3.bf16.msra.mxu1 %v285_v12 }
  0xdc   :  { %v85_v14 = vpop.f32.mrb[0].mxu0 }
  0xdd   :  { %v86_v15 = vadd.f32 %v220_v13, %v85_v14  ;;  %v251_v16 = vpop.f32.mrb[1].mxu0 }
  0xde   :  { %v88_v17 = vpop.f32.mrb[2].mxu0 }
  0xdf   :  { %v91_v18 = vmax.f32 %v86_v15, 0.0  ;;  %v252_v19 = vpop.f32.mrb[3].mxu0 }
  0xe1   :  { %v92_v20 = vpack.c.bf16 %v91_v18, %v91_v18 }
  0xe3   :  { %270 = vmatmul.mubr.bf16.vlgmr.msra.gmra.mrb[0].mxu1 %v92_v20 }
 0x1b6   :  { %v198_v22 = vpop.f32.mrb[0].mxu1 }
 0x1b7   :  { %v199_v23 = vadd.f32 %v224_v21, %v198_v22  ;;  %v271_v24 = vpop.f32.mrb[1].mxu1 }
 0x1b8   :  { %v201_v25 = vpop.f32.mrb[2].mxu1 }
 0x1b9   :  { %v272_v26 = vpop.f32.mrb[3].mxu1  ;;  %205 = vst.msk [vmem:[#allocation2] sm:$0xff] %vm204_vm2, %v199_v23 }
 0x1ba   :  { %297 = shalt.err (!%p294_p4)
}
 0x1bb   :  { %s298_s4 = scalar_lea.hbm %s399_s5, 128 }
 0x1bc   :  { %p299_p5 = scmp.ne.s32.totalorder %s399_s5, %s298_s4  ;;  %p302_p6 = scmp.lt.u32.totalorder %s298_s4, %s399_s5 }
 0x1be   :  { %p304_p7 = pnand %p302_p6, %p299_p5 }
 0x1c0   :  { %307 = shalt.err (!%p304_p7)
}
 0x1c1   :  { %215 = dma.vmem_to_hbm [thread:$0]  %s213_s18, 128, %s399_s5, [#allocation3]  }
 0x1c2   :  { %308 = dma.done.wait [#allocation3], 128  }
 0x1c3   :  { %309 = vsyncadd [#allocation3], 4294967168 }
 0x1c4   :  { %219 = vsyncpa [#allocation3], 1 }

</bundles_post_ra>
